<compile_context>
chip_gen: v6e
topology: v6e:2x2x1
jax: 0.10.0
libtpu: 0.0.40
codegen_flags: <defaults>
</compile_context>

<pallas_src>
import functools

import numpy as np
import jax
import jax.numpy as jnp
from jax.experimental import pallas as pl
from jax.experimental.pallas import tpu as pltpu


def _elu(x):
    # F.elu with alpha=1.0 (clamp keeps exp() finite on the untaken branch)
    return jnp.where(x > 0, x, jnp.exp(jnp.minimum(x, 0.0)) - 1.0)


# contract the LAST dim of both operands (A @ B.T)
_NT = (((1,), (1,)), ((), ()))


# ---------------- fused Pallas kernel ----------------

def gan_fused_kernel(xs_pad_ref, cur_t_ref, seg_ref,
                     w1h_ref, w1c_ref, b1_ref, w2_ref, b2_ref, wo_ref, bo_ref,
                     u_ref, segsum_ref, *, band_size, section_length):
    f32 = jnp.float32
    S = section_length
    N = cur_t_ref.shape[1]
    f = xs_pad_ref.shape[0]

    # ---- banded windowed history (replaces dense T @ Xs): O(band*S*f) VPU ----
    # xs_pad is Xs_clicked^T left-padded with band_size zero columns, so
    # sum_{k=0}^{band-1} xs_pad[:, k:k+S] == sum_{d=1}^{band} shift_right(Xs^T, d)
    xs_pad = xs_pad_ref[...]                                          # (f, band+S)
    acc = jnp.zeros((f, S), f32)
    for k in range(band_size):                                        # static unroll
        acc = acc + xs_pad[:, k:k + S]
    hist_t = acc * 1e-4                                               # (f, S)

    # first layer in transposed orientation (items on lanes)
    hist_h1 = jnp.dot(w1h_ref[...], hist_t,
                      preferred_element_type=f32)                     # (H1, S)
    cur_h1 = jnp.dot(w1c_ref[...], cur_t_ref[...],
                     preferred_element_type=f32)                      # (H1, N)

    # one-hot section->item map built in-kernel (no HBM one-hot buffer)  (S, N)
    onehot_sn = (jax.lax.broadcasted_iota(jnp.int32, (S, N), 0)
                 == seg_ref[...]).astype(f32)

    # gather the history contribution per displayed item (MXU)           (H1, N)
    gath_h1 = jnp.dot(hist_h1, onehot_sn, preferred_element_type=f32)

    h1 = _elu(gath_h1 + cur_h1 + b1_ref[...])                          # (H1, N)
    h2 = _elu(jnp.dot(w2_ref[...], h1, preferred_element_type=f32)
              + b2_ref[...])                                           # (H2, N)

    # 1-wide output layer on VPU + XLU sublane reduce (MXU stays free)   (1, N)
    u_row = jnp.sum(h2 * wo_ref[...], axis=0, keepdims=True) + bo_ref[...]
    u_ref[...] = u_row                                                 # lane-dense

    # segment sum of exp(u): (1,N)·(S,N)^T -> lane-dense (1,S) on the MXU
    e_row = jnp.exp(u_row)
    segsum_ref[...] = jax.lax.dot_general(e_row, onehot_sn, _NT,
                                          preferred_element_type=f32)  # (1, S)


# ---------------- wrapper ----------------

_VMEM = pl.BlockSpec(memory_space=pltpu.MemorySpace.VMEM)


def fold_gan_params(params, *, pw_dim, f_dim):
    """One-time parameter preprocessing (hoisted out of the per-forward path)."""
    w1, b1, w2, b2, wo, bo = params
    hdim1 = w1.shape[1]
    hdim2 = w2.shape[1]
    # exact fold of concat([hist]*pw_dim) @ W1_hist  ->  hist @ sum_k W1_k
    w1h_t = jnp.sum(w1[:pw_dim * f_dim, :].reshape(pw_dim, f_dim, hdim1),
                    axis=0).T                         # (H1, f)
    w1c_t = w1[pw_dim * f_dim:, :].T                  # (H1, f)
    return (w1h_t, w1c_t,
            b1.reshape(hdim1, 1),                     # (H1, 1)
            w2.T,                                     # (H2, H1)
            b2.reshape(hdim2, 1),                     # (H2, 1)
            wo.reshape(hdim2, 1),                     # (H2, 1)
            bo.reshape(1, 1))                         # (1, 1)


def _band_structure_ok(cumsum_tril_indices, cumsum_tril_value_indices,
                       section_length, band_size):
    """Verify the sparse indices are the standard banded cumsum-tril pattern."""
    try:
        idx = np.asarray(cumsum_tril_indices).reshape(-1, 2).astype(np.int64)
        vidx = np.asarray(cumsum_tril_value_indices).reshape(-1).astype(np.int64)
    except Exception:
        return True  # traced under jit; assume the standard structure
    exp = [(i, j) for i in range(section_length)
           for j in range(max(0, i - band_size), i)]
    exp = np.asarray(exp, np.int64).reshape(-1, 2)
    if idx.shape != exp.shape:
        return False
    order = np.lexsort((idx[:, 1], idx[:, 0]))
    if not np.array_equal(idx[order], exp):
        return False
    # value indices only gather (identical) 1e-4 entries -> range-check only
    return bool(np.all((vidx >= 0) & (vidx < band_size)))


def _pad2(shape):
    """f32 element count of a 2-D buffer padded to the (8,128) vreg tile."""
    r, c = (1, shape[0]) if len(shape) == 1 else (shape[-2], shape[-1])
    return (-(-r // 8) * 8) * (-(-c // 128) * 128)


def gan_net_forward(section_length, item_size, cumsum_tril_value_indices,
                    cumsum_tril_indices, Xs_clicked, disp_2d_split_sec_ind,
                    disp_current_feature, folded_params, *, pw_dim, band_size,
                    num_segments):
    del item_size, pw_dim   # item_size only sets denseshape; pw_dim already folded
    f_dim = Xs_clicked.shape[1]
    n_disp = disp_current_feature.shape[0]

    if not _band_structure_ok(cumsum_tril_indices, cumsum_tril_value_indices,
                              section_length, band_size):
        # TODO(synk): general (non-banded) sparse cumsum patterns: scatter-add
        # hist = sum_nnz 1e-4 * Xs[col] per row in the wrapper (O(nnz*f)) and
        # feed the precomputed history to a kernel variant.
        raise NotImplementedError(
            "cumsum_tril_indices do not match the standard banded structure")

    w1h_t, w1c_t, b1_c, w2_t, b2_c, wo_c, bo_c = folded_params
    hdim1, hdim2 = w1h_t.shape[0], w2_t.shape[0]

    # transposed + zero-padded operands (items/sections on lanes inside the kernel)
    xs_pad = jnp.pad(Xs_clicked.astype(jnp.float32).T,
                     ((0, 0), (band_size, 0)))              # (f, band + S)
    cur_t = disp_current_feature.astype(jnp.float32).T      # (f, N)
    seg_row = disp_2d_split_sec_ind.astype(jnp.int32).reshape(1, n_disp)

    S, N, f = section_length, n_disp, f_dim
    flops = (2 * (hdim1 * f * S + hdim1 * f * N + hdim1 * S * N
                  + hdim2 * hdim1 * N + hdim2 * N + S * N)
             + band_size * S * f + S * N)
    transcendentals = N * (hdim1 + hdim2 + 1)
    io_shapes = [(f, band_size + S), (f, N), (1, N), (hdim1, f), (hdim1, f),
                 (hdim1, 1), (hdim2, hdim1), (hdim2, 1), (hdim2, 1), (1, 1),
                 (1, N), (1, S)]
    bytes_accessed = int(4 * sum(int(np.prod(s)) for s in io_shapes))
    live_shapes = [(f, S), (hdim1, S), (hdim1, N), (S, N), (hdim1, N),
                   (hdim2, N), (1, N), (1, S)]
    footprint = 4 * (2 * sum(_pad2(s) for s in io_shapes)
                     + sum(_pad2(s) for s in live_shapes))
    vmem_limit = int(min(64 << 20, max(16 << 20, 4 * footprint)))

    u_row, segsum_row = pl.pallas_call(
        functools.partial(gan_fused_kernel, band_size=band_size,
                          section_length=section_length),
        out_shape=(jax.ShapeDtypeStruct((1, n_disp), jnp.float32),
                   jax.ShapeDtypeStruct((1, section_length), jnp.float32)),
        in_specs=[_VMEM] * 10,
        out_specs=(_VMEM, _VMEM),
        compiler_params=pltpu.CompilerParams(vmem_limit_bytes=vmem_limit),
        cost_estimate=pl.CostEstimate(flops=int(flops),
                                      transcendentals=int(transcendentals),
                                      bytes_accessed=bytes_accessed),
    )(xs_pad, cur_t, seg_row, w1h_t, w1c_t, b1_c, w2_t, b2_c, wo_c, bo_c)

    u_disp = u_row.reshape(n_disp, 1)
    # segment ids are dense in [0, num_segments); rows beyond are all zero.
    sum_exp_disp_ubar_ut = segsum_row.reshape(section_length, 1)[:num_segments]
    return u_disp, sum_exp_disp_ubar_ut


# ---------------- deterministic parameter init ----------------

def init_mlp_params(key, x_dim, hidden_dims, output_dim, sd=0.001):
    dims = [x_dim] + list(hidden_dims) + [output_dim]
    params = []
    for i in range(len(dims) - 1):
        key, kw, kb = jax.random.split(key, 3)
        # nn.Linear weight: normal_(std=sd); bias: uniform(-1/sqrt(in), 1/sqrt(in))
        w = sd * jax.random.normal(kw, (dims[i], dims[i + 1]), jnp.float32)
        bound = 1.0 / np.sqrt(dims[i])
        b = jax.random.uniform(kb, (1, dims[i + 1]), jnp.float32, -bound, bound)
        params += [w, b]
    return tuple(params)


# ---------------- pure-JAX reference (general sparse path, for correctness) ----------------

def reference(section_length, cumsum_tril_value_indices, cumsum_tril_indices,
              Xs_clicked, disp_ind, disp_cur, params, pw_dim, band_size,
              num_segments):
    pw = jnp.full((band_size,), 1e-4, jnp.float32)
    vals = pw[cumsum_tril_value_indices]
    T = jnp.zeros((section_length, section_length), jnp.float32).at[
        cumsum_tril_indices[:, 0], cumsum_tril_indices[:, 1]].add(vals)
    hist = T @ Xs_clicked
    x = jnp.concatenate([jnp.take(jnp.concatenate([hist] * pw_dim, 1), disp_ind, 0),
                         disp_cur], axis=1)
    w1, b1, w2, b2, wo, bo = params
    h = _elu(x @ w1 + b1)
    h = _elu(h @ w2 + b2)
    u = h @ wo + bo
    e = jnp.exp(u)
    seg = jnp.zeros((num_segments, 1), jnp.float32).at[disp_ind].add(e)
    return u, seg


if __name__ == "__main__":
    # small but representative shapes
    section_length = 16      # number of "sections"
    item_size = 10           # only used for torch.Size bookkeeping in the original
    f_dim = 8                # feature dim of clicked / displayed items
    pw_dim = 2               # args.pw_dim
    band_size = 4            # args.pw_band_size
    hidden_dims = (32, 16)   # args.dims = "32-16"
    items_per_section = 2

    key = jax.random.PRNGKey(0)
    k_xs, k_disp, k_params = jax.random.split(key, 3)

    # cumsum-tril sparse structure: row i attends to the previous band_size rows
    tril_idx, tril_val_idx = [], []
    for i in range(section_length):
        for j in range(max(0, i - band_size), i):
            tril_idx.append((i, j))
            tril_val_idx.append(i - j - 1)        # index into position_weight
    cumsum_tril_indices = jnp.asarray(np.array(tril_idx, dtype=np.int32))
    cumsum_tril_value_indices = jnp.asarray(np.array(tril_val_idx, dtype=np.int32))

    Xs_clicked = jax.random.normal(k_xs, (section_length, f_dim), jnp.float32)

    # sorted section index per displayed item (every section displayed -> dense ids)
    disp_np = np.repeat(np.arange(section_length, dtype=np.int32), items_per_section)
    disp_2d_split_sec_ind = jnp.asarray(disp_np)
    num_segments = int(len(np.unique(disp_np)))   # == section_length here
    assert disp_np.min() == 0 and disp_np.max() == num_segments - 1, \
        "segment ids must be dense in [0, num_segments)"
    n_disp = disp_np.shape[0]

    disp_current_feature = jax.random.normal(k_disp, (n_disp, f_dim), jnp.float32)

    x_dim = f_dim * pw_dim + f_dim
    params = init_mlp_params(k_params, x_dim, hidden_dims, 1, sd=0.001)

    # one-time parameter fold (hoisted out of the per-forward path)
    folded = fold_gan_params(params, pw_dim=pw_dim, f_dim=f_dim)

    # jit the forward so the tiny pre/post glue fuses with the pallas_call
    forward = jax.jit(lambda xs, seg, cur: gan_net_forward(
        section_length, item_size, cumsum_tril_value_indices, cumsum_tril_indices,
        xs, seg, cur, folded, pw_dim=pw_dim, band_size=band_size,
        num_segments=num_segments))

    u_disp, sum_exp = forward(Xs_clicked, disp_2d_split_sec_ind,
                              disp_current_feature)
    jax.block_until_ready((u_disp, sum_exp))

    u_ref, s_ref = reference(section_length, cumsum_tril_value_indices,
                             cumsum_tril_indices, Xs_clicked, disp_2d_split_sec_ind,
                             disp_current_feature, params, pw_dim, band_size,
                             num_segments)
    assert np.allclose(np.asarray(u_disp), np.asarray(u_ref), rtol=1e-5, atol=1e-5)
    assert np.allclose(np.asarray(sum_exp), np.asarray(s_ref), rtol=1e-5, atol=1e-5)

    print("KERNEL_OK")
</pallas_src>

<mosaic_0001>
module attributes {stable_mosaic.version = 11 : i64} {
  func.func @gan_fused_kernel(%arg0: memref<8x20xf32, #tpu.memory_space<vmem>>, %arg1: memref<8x32xf32, #tpu.memory_space<vmem>>, %arg2: memref<1x32xi32, #tpu.memory_space<vmem>>, %arg3: memref<32x8xf32, #tpu.memory_space<vmem>>, %arg4: memref<32x8xf32, #tpu.memory_space<vmem>>, %arg5: memref<32x1xf32, #tpu.memory_space<vmem>>, %arg6: memref<16x32xf32, #tpu.memory_space<vmem>>, %arg7: memref<16x1xf32, #tpu.memory_space<vmem>>, %arg8: memref<16x1xf32, #tpu.memory_space<vmem>>, %arg9: memref<1x1xf32, #tpu.memory_space<vmem>>, %arg10: memref<1x32xf32, #tpu.memory_space<vmem>>, %arg11: memref<1x16xf32, #tpu.memory_space<vmem>>) attributes {dimension_semantics = [], scalar_prefetch = 0 : i64, scratch_operands = 0 : i64, tpu.core_type = #tpu.core_type<tc>} {
    %c0 = arith.constant 0 : index
    %c0_0 = arith.constant 0 : index
    %0 = vector.load %arg0[%c0, %c0_0] : memref<8x20xf32, #tpu.memory_space<vmem>>, vector<8x20xf32>
    %cst = arith.constant 0.000000e+00 : f32
    %1 = vector.broadcast %cst : f32 to vector<8x16xf32>
    %2 = vector.extract_strided_slice %0 {offsets = [0, 0], sizes = [8, 16], strides = [1, 1]} : vector<8x20xf32> to vector<8x16xf32>
    %3 = arith.addf %1, %2 : vector<8x16xf32>
    %4 = vector.extract_strided_slice %0 {offsets = [0, 1], sizes = [8, 16], strides = [1, 1]} : vector<8x20xf32> to vector<8x16xf32>
    %5 = arith.addf %3, %4 : vector<8x16xf32>
    %6 = vector.extract_strided_slice %0 {offsets = [0, 2], sizes = [8, 16], strides = [1, 1]} : vector<8x20xf32> to vector<8x16xf32>
    %7 = arith.addf %5, %6 : vector<8x16xf32>
    %8 = vector.extract_strided_slice %0 {offsets = [0, 3], sizes = [8, 16], strides = [1, 1]} : vector<8x20xf32> to vector<8x16xf32>
    %9 = arith.addf %7, %8 : vector<8x16xf32>
    %cst_1 = arith.constant 9.99999974E-5 : f32
    %10 = vector.broadcast %cst_1 : f32 to vector<8x16xf32>
    %11 = arith.mulf %9, %10 : vector<8x16xf32>
    %c0_2 = arith.constant 0 : index
    %c0_3 = arith.constant 0 : index
    %12 = vector.load %arg3[%c0_2, %c0_3] : memref<32x8xf32, #tpu.memory_space<vmem>>, vector<32x8xf32>
    %cst_4 = arith.constant dense<0.000000e+00> : vector<32x16xf32>
    %13 = tpu.matmul %12, %11, %cst_4 {dimension_numbers = #tpu.dot_dimension_numbers<[1], [0], [0], [1], [0, 0, 1, 1], [], []>} : vector<32x8xf32>, vector<8x16xf32>, vector<32x16xf32> -> vector<32x16xf32>
    %c0_5 = arith.constant 0 : index
    %c0_6 = arith.constant 0 : index
    %14 = vector.load %arg4[%c0_5, %c0_6] : memref<32x8xf32, #tpu.memory_space<vmem>>, vector<32x8xf32>
    %c0_7 = arith.constant 0 : index
    %c0_8 = arith.constant 0 : index
    %15 = vector.load %arg1[%c0_7, %c0_8] : memref<8x32xf32, #tpu.memory_space<vmem>>, vector<8x32xf32>
    %cst_9 = arith.constant dense<0.000000e+00> : vector<32x32xf32>
    %16 = tpu.matmul %14, %15, %cst_9 {dimension_numbers = #tpu.dot_dimension_numbers<[1], [0], [0], [1], [0, 0, 1, 1], [], []>} : vector<32x8xf32>, vector<8x32xf32>, vector<32x32xf32> -> vector<32x32xf32>
    %17 = tpu.iota {dimensions = array<i32: 0>} : vector<16x32xi32>
    %c0_10 = arith.constant 0 : index
    %c0_11 = arith.constant 0 : index
    %18 = vector.load %arg2[%c0_10, %c0_11] : memref<1x32xi32, #tpu.memory_space<vmem>>, vector<1x32xi32>
    %19 = vector.broadcast %18 : vector<1x32xi32> to vector<16x32xi32>
    %20 = arith.cmpi eq, %17, %19 : vector<16x32xi32>
    %21 = arith.extui %20 : vector<16x32xi1> to vector<16x32xi32>
    %22 = arith.sitofp %21 : vector<16x32xi32> to vector<16x32xf32>
    %cst_12 = arith.constant dense<0.000000e+00> : vector<32x32xf32>
    %23 = tpu.matmul %13, %22, %cst_12 {dimension_numbers = #tpu.dot_dimension_numbers<[1], [0], [0], [1], [0, 0, 1, 1], [], []>} : vector<32x16xf32>, vector<16x32xf32>, vector<32x32xf32> -> vector<32x32xf32>
    %24 = arith.addf %23, %16 : vector<32x32xf32>
    %c0_13 = arith.constant 0 : index
    %c0_14 = arith.constant 0 : index
    %25 = vector.load %arg5[%c0_13, %c0_14] : memref<32x1xf32, #tpu.memory_space<vmem>>, vector<32x1xf32>
    %26 = vector.broadcast %25 : vector<32x1xf32> to vector<32x32xf32>
    %27 = arith.addf %24, %26 : vector<32x32xf32>
    %cst_15 = arith.constant 0.000000e+00 : f32
    %28 = vector.broadcast %cst_15 : f32 to vector<32x32xf32>
    %29 = arith.cmpf ogt, %27, %28 : vector<32x32xf32>
    %cst_16 = arith.constant 0.000000e+00 : f32
    %30 = vector.broadcast %cst_16 : f32 to vector<32x32xf32>
    %31 = arith.minimumf %27, %30 : vector<32x32xf32>
    %32 = math.exp %31 : vector<32x32xf32>
    %cst_17 = arith.constant 1.000000e+00 : f32
    %33 = vector.broadcast %cst_17 : f32 to vector<32x32xf32>
    %34 = arith.subf %32, %33 : vector<32x32xf32>
    %35 = arith.select %29, %27, %34 : vector<32x32xi1>, vector<32x32xf32>
    %c0_18 = arith.constant 0 : index
    %c0_19 = arith.constant 0 : index
    %36 = vector.load %arg6[%c0_18, %c0_19] : memref<16x32xf32, #tpu.memory_space<vmem>>, vector<16x32xf32>
    %cst_20 = arith.constant dense<0.000000e+00> : vector<16x32xf32>
    %37 = tpu.matmul %36, %35, %cst_20 {dimension_numbers = #tpu.dot_dimension_numbers<[1], [0], [0], [1], [0, 0, 1, 1], [], []>} : vector<16x32xf32>, vector<32x32xf32>, vector<16x32xf32> -> vector<16x32xf32>
    %c0_21 = arith.constant 0 : index
    %c0_22 = arith.constant 0 : index
    %38 = vector.load %arg7[%c0_21, %c0_22] : memref<16x1xf32, #tpu.memory_space<vmem>>, vector<16x1xf32>
    %39 = vector.broadcast %38 : vector<16x1xf32> to vector<16x32xf32>
    %40 = arith.addf %37, %39 : vector<16x32xf32>
    %cst_23 = arith.constant 0.000000e+00 : f32
    %41 = vector.broadcast %cst_23 : f32 to vector<16x32xf32>
    %42 = arith.cmpf ogt, %40, %41 : vector<16x32xf32>
    %cst_24 = arith.constant 0.000000e+00 : f32
    %43 = vector.broadcast %cst_24 : f32 to vector<16x32xf32>
    %44 = arith.minimumf %40, %43 : vector<16x32xf32>
    %45 = math.exp %44 : vector<16x32xf32>
    %cst_25 = arith.constant 1.000000e+00 : f32
    %46 = vector.broadcast %cst_25 : f32 to vector<16x32xf32>
    %47 = arith.subf %45, %46 : vector<16x32xf32>
    %48 = arith.select %42, %40, %47 : vector<16x32xi1>, vector<16x32xf32>
    %c0_26 = arith.constant 0 : index
    %c0_27 = arith.constant 0 : index
    %49 = vector.load %arg8[%c0_26, %c0_27] : memref<16x1xf32, #tpu.memory_space<vmem>>, vector<16x1xf32>
    %50 = vector.broadcast %49 : vector<16x1xf32> to vector<16x32xf32>
    %51 = arith.mulf %48, %50 : vector<16x32xf32>
    %cst_28 = arith.constant dense<0.000000e+00> : vector<32xf32>
    %52 = vector.multi_reduction <add>, %51, %cst_28 [0] : vector<16x32xf32> to vector<32xf32>
    %53 = vector.shape_cast %52 : vector<32xf32> to vector<1x32xf32>
    %c0_29 = arith.constant 0 : index
    %c0_30 = arith.constant 0 : index
    %54 = vector.load %arg9[%c0_29, %c0_30] : memref<1x1xf32, #tpu.memory_space<vmem>>, vector<1x1xf32>
    %55 = vector.broadcast %54 : vector<1x1xf32> to vector<1x32xf32>
    %56 = arith.addf %53, %55 : vector<1x32xf32>
    %c0_31 = arith.constant 0 : index
    %c0_32 = arith.constant 0 : index
    %57 = vector.load %arg10[%c0_31, %c0_32] : memref<1x32xf32, #tpu.memory_space<vmem>>, vector<1x32xf32>
    tpu.vector_store %arg10[%c0_31, %c0_32], %56 {strides = array<i32>} : memref<1x32xf32, #tpu.memory_space<vmem>>, vector<1x32xf32>,
    %58 = math.exp %56 : vector<1x32xf32>
    %cst_33 = arith.constant dense<0.000000e+00> : vector<1x16xf32>
    %59 = tpu.matmul %58, %22, %cst_33 {dimension_numbers = #tpu.dot_dimension_numbers<[1], [1], [0], [0], [0, 0, 1, 0], [], []>} : vector<1x32xf32>, vector<16x32xf32>, vector<1x16xf32> -> vector<1x16xf32>
    %c0_34 = arith.constant 0 : index
    %c0_35 = arith.constant 0 : index
    %60 = vector.load %arg11[%c0_34, %c0_35] : memref<1x16xf32, #tpu.memory_space<vmem>>, vector<1x16xf32>
    tpu.vector_store %arg11[%c0_34, %c0_35], %59 {strides = array<i32>} : memref<1x16xf32, #tpu.memory_space<vmem>>, vector<1x16xf32>,
    return
  }
}

</mosaic_0001>

<bundles_post_ra>
// kernel: _lambda_.1
= control target key start
LH: loop header
LB: loop body
LE: loop exit
PB: predicated region body
PF: predicated region fallthrough
CT: control target
= control target key end

     0   :  { %s1205_s0 = inlined_call_operand.vmem [shape: f32[8,20], index: 0, kind: input, shape index: {}]   ;;  %s1206_s1 = inlined_call_operand.hbm [shape: f32[8,32], index: 1, kind: input, shape index: {}]   ;;  %s1207_s2 = inlined_call_operand.vmem [shape: s32[1,32], index: 2, kind: input, shape index: {}]   ;;  %s1208_s3 = inlined_call_operand.hbm [shape: f32[32,8], index: 3, kind: input, shape index: {}]   ;;  %s1209_s4 = inlined_call_operand.hbm [shape: f32[32,8], index: 4, kind: input, shape index: {}]   ;;  %s1210_s5 = inlined_call_operand.hbm [shape: f32[32,1], index: 5, kind: input, shape index: {}]   ;;  %s1211_s6 = inlined_call_operand.hbm [shape: f32[16,32], index: 6, kind: input, shape index: {}]   ;;  %s1212_s7 = inlined_call_operand.vmem [shape: f32[16,1], index: 7, kind: input, shape index: {}]   ;;  %s1213_s8 = inlined_call_operand.vmem [shape: f32[16,1], index: 8, kind: input, shape index: {}]   ;;  %s1214_s9 = inlined_call_operand.<no memory space> [shape: f32[1,1], index: 9, kind: input, shape index: {}]   ;;  %s1215_s10 = inlined_call_operand.hbm [shape: f32[1,32], index: 10, kind: output, shape index: {0}]   ;;  %s1216_s11 = inlined_call_operand.hbm [shape: f32[1,16], index: 11, kind: output, shape index: {1}]  }
   0x1   :  { %v17_v0 = vstv %s1214_s9 }
   0x2   :  { %18 = vst [vmem:[#allocation2] sm:$0x1] %v17_v0 }
   0x3   :  { %19 = vsyncpa [#allocation4], 0 }
   0x4   :  { %20 = vsyncpa [#allocation7], 0 }
   0x5   :  { %21 = vsyncpa [#allocation10], 0 }
   0x6   :  { %22 = vsyncpa [#allocation5], 0 }
   0x7   :  { %23 = vsyncpa [#allocation14], 0  ;;  %s1030_s19 = smov [#allocation6]  }
   0x8   :  { %s43_s20 = sshll.u32 %s1030_s19, 4  ;;  %s44_s20 = int_to_ptr.vmem [resolvable:$true] %s43_s20 }
   0x9   :  { %s888_s21 = scalar_lea.vmem %s44_s20, 512  ;;  %p893_p1 = scmp.lt.s32.totalorder %s44_s20, %s44_s20 }
   0xa   :  { %p889_p0 = scmp.ne.s32.totalorder %s44_s20, %s888_s21  ;;  %p894_p2 = scmp.lt.s32.totalorder %s888_s21, %s888_s21 }
   0xc   :  { %p895_p3 = por %p894_p2, %p893_p1 }
   0xe   :  { %p896_p4 = pnand %p895_p3, %p889_p0 }
  0x10   :  { %899 = shalt.err (!%p896_p4)
}
  0x11   :  { %s1031_s22 = smov 128   ;;  %s1032_s23 = smov 8  }
  0x12   :  { %49 = dma.hbm_to_vmem [thread:$0]  %s1208_s3, 512, %s44_s20, [#allocation7], %s1031_s22, %s1031_s22, %s1032_s23  }
  0x13   :  { %s1033_s25 = smov [#allocation9]   ;;  %s1034_s27 = smov [#allocation3]  }
  0x14   :  { %s67_s26 = sshll.u32 %s1033_s25, 4  ;;  %s32_s28 = sshll.u32 %s1034_s27, 4  ;;  %s68_s26 = int_to_ptr.vmem [resolvable:$true] %s67_s26  ;;  %s33_s28 = int_to_ptr.vmem [resolvable:$true] %s32_s28 }
  0x15   :  { %s908_s29 = scalar_lea.vmem %s68_s26, 512  ;;  %p913_p6 = scmp.lt.s32.totalorder %s68_s26, %s68_s26 }
  0x16   :  { %p909_p5 = scmp.ne.s32.totalorder %s68_s26, %s908_s29  ;;  %p914_p7 = scmp.lt.s32.totalorder %s908_s29, %s908_s29 }
  0x18   :  { %p915_p8 = por %p914_p7, %p913_p6 }
  0x1a   :  { %p916_p9 = pnand %p915_p8, %p909_p5 }
  0x1c   :  { %919 = shalt.err (!%p916_p9)
}
  0x1d   :  { %73 = dma.hbm_to_vmem [thread:$0]  %s1210_s5, 512, %s68_s26, [#allocation10], %s1031_s22, %s1031_s22, %s1032_s23  }
  0x1e   :  { %s928_s3 = scalar_lea.vmem %s33_s28, 128  ;;  %p933_p11 = scmp.lt.s32.totalorder %s33_s28, %s33_s28 }
  0x1f   :  { %p929_p10 = scmp.ne.s32.totalorder %s33_s28, %s928_s3  ;;  %p934_p12 = scmp.lt.s32.totalorder %s928_s3, %s928_s3 }
  0x21   :  { %p935_p13 = por %p934_p12, %p933_p11 }
  0x23   :  { %p936_p0 = pnand %p935_p13, %p929_p10 }
  0x25   :  { %939 = shalt.err (!%p936_p0)
}
  0x26   :  { %35 = dma.hbm_to_vmem [thread:$0]  %s1206_s1, 128, %s33_s28, [#allocation4]  }
  0x27   :  { %s1035_s15 = smov [#allocation8]   ;;  %s1036_s17 = smov [#allocation11]  }
  0x28   :  { %s55_s16 = sshll.u32 %s1035_s15, 4  ;;  %s79_s18 = sshll.u32 %s1036_s17, 4  ;;  %s56_s16 = int_to_ptr.vmem [resolvable:$true] %s55_s16  ;;  %s80_s18 = int_to_ptr.vmem [resolvable:$true] %s79_s18 }
  0x29   :  { %s948_s19 = scalar_lea.vmem %s56_s16, 512  ;;  %p953_p2 = scmp.lt.s32.totalorder %s56_s16, %s56_s16 }
  0x2a   :  { %p949_p1 = scmp.ne.s32.totalorder %s56_s16, %s948_s19  ;;  %p954_p3 = scmp.lt.s32.totalorder %s948_s19, %s948_s19 }
  0x2c   :  { %p955_p4 = por %p954_p3, %p953_p2 }
  0x2e   :  { %p956_p5 = pnand %p955_p4, %p949_p1 }
  0x30   :  { %959 = shalt.err (!%p956_p5)
}
  0x31   :  { %61 = dma.hbm_to_vmem [thread:$0]  %s1209_s4, 512, %s56_s16, [#allocation7], %s1031_s22, %s1031_s22, %s1032_s23  }
  0x32   :  { %s968_s1 = scalar_lea.vmem %s80_s18, 256  ;;  %p973_p7 = scmp.lt.s32.totalorder %s80_s18, %s80_s18 }
  0x33   :  { %p969_p6 = scmp.ne.s32.totalorder %s80_s18, %s968_s1  ;;  %p974_p8 = scmp.lt.s32.totalorder %s968_s1, %s968_s1 }
  0x35   :  { %p975_p9 = por %p974_p8, %p973_p7 }
  0x37   :  { %p976_p10 = pnand %p975_p9, %p969_p6 }
  0x39   :  { %979 = shalt.err (!%p976_p10)
}
  0x3a   :  { %85 = dma.hbm_to_vmem [thread:$0]  %s1211_s6, 256, %s80_s18, [#allocation10], %s1031_s22, %s1031_s22, %s1032_s23  }
  0x3b   :  { %1020 = dma.done.wait [#allocation4], 128  }
  0x3c   :  { %1021 = vsyncadd [#allocation4], 4294967168 }
  0x3d   :  { %1022 = dma.done.wait [#allocation7], 1024  }
  0x3e   :  { %1023 = vsyncadd [#allocation7], 4294966272 }
  0x3f   :  { %1024 = dma.done.wait [#allocation10], 768  }
  0x40   :  { %1025 = vsyncadd [#allocation10], 4294966528  ;;  %vm127_vm0 = vcmask 64512   ;;  %v107_v1 = vld [vmem:[%s1205_s0] sm:$0xff]  ;;  %v123_v2 = vld [vmem:[#allocation6] sm:$0xff]  ;;  %s1037_s25 = smov 127   ;;  %v327_v13 = vlaneseq }
  0x41   :  { %110 = vrot.lane.b32.xlu0 %v107_v1, %s1037_s25  ;;  %s1038_s26 = smov 125   ;;  %v125_v3 = vld [vmem:[#allocation6 + $0x10] sm:$0xff]  ;;  %804 = vmatprep.mubr.msk.f32.mxu0 %vm127_vm0, %v123_v2  ;;  %s1039_s6 = smov 126   ;;  %v124_v11 = vld [vmem:[#allocation6 + $0x8] sm:$0xff]  ;;  %v126_v12 = vld [vmem:[#allocation6 + $0x18] sm:$0xff]  ;;  %v1040_v18 = vmov 1.0  }
  0x42   :  { %118 = vrot.lane.b32.xlu1 %v107_v1, %s1038_s26  ;;  %807 = vmatprep.mubr.msk.f32.mxu1 %vm127_vm0, %v125_v3  ;;  %v1143_v14 = vshrl.u32 %v327_v13, 7  ;;  %v1151_v16 = vld [vmem:[%s1207_s2] ss:$0 sm:$0xff]  ;;  %v229_v17 = vld [vmem:[#allocation3] sm:$0xff]  ;;  %v225_v19 = vld [vmem:[#allocation8] sm:$0xff]  ;;  %v1041_v24 = vmov 0  }
  0x43   :  { %v226_v20 = vld [vmem:[#allocation8 + $0x8] sm:$0xff]  ;;  %v227_v21 = vld [vmem:[#allocation8 + $0x10] sm:$0xff]  ;;  %v228_v22 = vld [vmem:[#allocation8 + $0x18] sm:$0xff]  ;;  %864 = vset.pattern.permute.xlu1 %v1041_v24  ;;  %865 = vset.pattern.permute.xlu0 %v1041_v24  ;;  %vm341_vm3 = vcmask 130048   ;;  %vm505_vm4 = vcmask 261120   ;;  %vm1043_vm9 = vmmov 0  }
  0x44   :  { %v1146_v15 = vadd.s32 8, %v1143_v14  ;;  %vm335_vm2 = vcmp.eq.s32.totalorder %v1143_v14, %v1151_v16  ;;  %v442_v23 = vld [vmem:[#allocation9 + $0x18] sm:$0xff]  ;;  %v441_v25 = vld [vmem:[#allocation9 + $0x10] sm:$0xff]  ;;  %v440_v26 = vld [vmem:[#allocation9 + $0x8] sm:$0xff]  ;;  %vm633_vm12 = vcmask 253952  }
  0x45   :  { %114 = vrot.lane.b32.xlu0 %v107_v1, %s1039_s6  ;;  %v493_v27 = vld [vmem:[%s1212_s7] sm:$0xff]  ;;  %v439_v28 = vld [vmem:[#allocation9] sm:$0xff] }
  0x46   :  { %vm336_vm1 = vcmp.eq.s32.totalorder %v1146_v15, %v1151_v16  ;;  %460 = vperm.xlu1 %864, %v442_v23   ;;  %v599_v29 = vld [vmem:[%s1213_s8] sm:$0xff]  ;;  %v494_v30 = vld [vmem:[%s1212_s7 + $0x8] sm:$0xff]  ;;  %s1044_s7 = smov [#allocation12]  }
  0x47   :  { %v622_v31 = vld [vmem:[#allocation2] sm:$0x1]  ;;  %v600_v32 = vld [vmem:[%s1213_s8 + $0x8] sm:$0xff]  ;;  %s724_s8 = sshll.u32 %s1044_s7, 4  ;;  %s725_s8 = int_to_ptr.vmem [resolvable:$true] %s724_s8 }
  0x48   :  { %v491_v37 = vld [vmem:[#allocation11] sm:$0xff]  ;;  %s980_s13 = scalar_lea.vmem %s725_s8, 16  ;;  %s984_s14 = scalar_lea.vmem %s725_s8, 32 }
  0x49   :  { %455 = vperm.xlu0 %865, %v441_v25   ;;  %p981_p11 = scmp.ne.s32.totalorder %s725_s8, %s980_s13  ;;  %p985_p12 = scmp.lt.s32.totalorder %s725_s8, %s725_s8 }
  0x4a   :  { %450 = vperm.xlu1 %864, %v440_v26   ;;  %p986_p13 = scmp.lt.s32.totalorder %s984_s14, %s980_s13 }
  0x4c   :  { %p987_p0 = por %p986_p13, %p985_p12 }
  0x4d   :  { %497 = vperm.xlu0 %865, %v493_v27  }
  0x4e   :  { %445 = vperm.xlu1 %864, %v439_v28   ;;  %p988_p1 = pnand %p987_p0, %p981_p11 }
  0x51   :  { %603 = vperm.xlu0 %865, %v599_v29  }
  0x52   :  { %502 = vperm.xlu1 %864, %v494_v30  }
  0x55   :  { %625 = vperm.xlu0 %865, %v622_v31  }
  0x56   :  { %608 = vperm.xlu1 %864, %v600_v32  }
  0xb3   :  { %v111_v4 = vpop.permute.xlu0 %110 }
  0xb4   :  { %v113_v5 = vadd.f32 %v111_v4, %v107_v1  ;;  %v119_v7 = vpop.permute.xlu1 %118 }
  0xb7   :  { %v115_v6 = vpop.permute.xlu0 %114 }
  0xb8   :  { %v117_v8 = vadd.f32 %v115_v6, %v113_v5 }
  0xba   :  { %v121_v9 = vadd.f32 %v119_v7, %v117_v8 }
  0xbc   :  { %v122_v10 = vmul.f32 0.0001, %v121_v9 }
  0xbe   :  { %802 = vmatprep.subr.mxu0 %v122_v10  ;;  %846 = vmatprep.subr.mxu1 %v122_v10 }
  0xbf   :  { %803 = vmatpush3.msra.mxu0 %v122_v10  ;;  %847 = vmatpush3.msra.mxu1 %v122_v10 }
  0xc0   :  { %805 = vmatmul.mubr.msk.f32.vlgmr.msra.gmra.mxu0 %vm127_vm0, %v124_v11  ;;  %808 = vmatmul.mubr.msk.f32.vlgmr.msra.gmra.mxu1 %vm127_vm0, %v126_v12 }
  0xc1   :  { %810 = vmatprep.subr.mxu1 %v229_v17  ;;  %818 = vmatprep.subr.msk.mxu0 %vm336_vm1, %v1040_v18  ;;  %v461_v38 = vpop.permute.xlu1 %460 }
  0xc2   :  { %811 = vmatpush3.msra.mxu1 %v229_v17  ;;  %812 = vmatprep.mubr.msk.f32.mxu1 %vm127_vm0, %v225_v19  ;;  %v492_v17 = vld [vmem:[#allocation11 + $0x8] sm:$0xff] }
  0xc3   :  { %819 = vmatpush3.msk.msra.mxu0 %vm336_vm1, %v1040_v18 }
  0xc4   :  { %813 = vmatmul.mubr.msk.f32.vlgmr.msra.gmra.mxu1 %vm127_vm0, %v226_v20  ;;  %820 = vmatprep.subr.msk.mxu0 %vm335_vm2, %v1040_v18  ;;  %v456_v58 = vpop.permute.xlu0 %455 }
  0xc5   :  { %821 = vmatpush3.msk.msra.mxu0 %vm335_vm2, %v1040_v18  ;;  %815 = vmatprep.mubr.msk.f32.mxu1 %vm127_vm0, %v227_v21  ;;  %v451_v40 = vpop.permute.xlu1 %450  ;;  %v1042_v18 = vmov 0.0  }
  0xc6   :  { %839 = vmatprep.subr.mxu0 %v1042_v18  ;;  %v759_v19 = vsel %vm336_vm1, 1.0, %v1042_v18  ;;  %v758_v20 = vsel %vm335_vm2, 1.0, %v1042_v18 }
  0xc8   :  { %816 = vmatmul.mubr.msk.f32.gmra.mxu1 %vm127_vm0, %v228_v22  ;;  %v498_v24 = vpop.permute.xlu0 %497 }
  0xc9   :  { %836 = vmatprep.mubr.msk.f32.mxu1 %vm505_vm4, %v491_v37  ;;  %v446_v48 = vpop.permute.xlu1 %445 }
  0xcd   :  { %v503_v21 = vpop.permute.xlu1 %502 }
  0xd1   :  { %v609_v16 = vpop.permute.xlu1 %608 }
 0x180   :  { %v806_v33 = vpop.f32.mrf.mxu0  ;;  %v809_v34 = vpop.f32.mrf.mxu1 }
 0x182   :  { %v206_v35 = vpop.f32.mrf.mxu0  ;;  %v216_v36 = vpop.f32.mrf.mxu1 }
 0x183   :  { %822 = vmatprep.mubr.msk.f32.mxu0 %vm341_vm3, %v206_v35 }
 0x184   :  { %823 = vmatmul.mubr.msk.f32.vlgmr.msra.gmra.mxu0 %vm341_vm3, %v806_v33  ;;  %v814_v39 = vpop.f32.mrf.mxu1 }
 0x185   :  { %825 = vmatprep.mubr.msk.f32.mxu0 %vm341_vm3, %v216_v36  ;;  %840 = vmatpush3.xpose.msk.msra.mxu0 %vm505_vm4, %v759_v19  ;;  %v604_v36 = vpop.permute.xlu0 %603 }
 0x186   :  { %v308_v41 = vpop.f32.mrf.mxu1  ;;  %841 = vmatprep.subr.mxu0 %v1042_v18 }
 0x188   :  { %826 = vmatmul.mubr.msk.f32.gmra.mxu0 %vm341_vm3, %v809_v34  ;;  %v817_v44 = vpop.f32.mrf.mxu1 }
 0x189   :  { %843 = vmatprep.mubr.msk.f32.mxu0 %vm1043_vm9, %v1042_v18  ;;  %842 = vmatpush3.xpose.msk.msra.mxu0 %vm505_vm4, %v758_v20 }
 0x18a   :  { %v318_v53 = vpop.f32.mrf.mxu1 }
 0x244   :  { %v824_v42 = vpop.f32.mrf.mxu0 }
 0x245   :  { %v426_v43 = vadd.f32 %v824_v42, %v814_v39 }
 0x246   :  { %v420_v45 = vpop.f32.mrf.mxu0 }
 0x247   :  { %v464_v46 = vadd.f32 %v451_v40, %v426_v43  ;;  %v421_v47 = vadd.f32 %v420_v45, %v308_v41  ;;  %v630_v45 = vsub.s32 0, %v1143_v14 }
 0x248   :  { %v827_v49 = vpop.f32.mrf.mxu0 }
 0x249   :  { %v472_v50 = vmin.f32 %v464_v46, 0.0  ;;  %v463_v51 = vadd.f32 %v446_v48, %v421_v47  ;;  %v436_v52 = vadd.f32 %v827_v49, %v817_v44  ;;  %vm468_vm7 = vcmp.gt.f32.partialorder %v464_v46, 0.0  ;;  %v626_v47 = vpop.permute.xlu0 %625 }
 0x24a   :  { %v430_v54 = vpop.f32.mrf.mxu0  ;;  %v631_v49 = vrot.slane %v626_v47, %v630_v45 }
 0x24b   :  { %v471_v55 = vmin.f32 %v463_v51, 0.0  ;;  %v466_v56 = vadd.f32 %v461_v38, %v436_v52  ;;  %v431_v57 = vadd.f32 %v430_v54, %v318_v53  ;;  %v477_v59 = vmul.f32 1.442695, %v472_v50 }
 0x24c   :  { %vm467_vm8 = vcmp.gt.f32.partialorder %v463_v51, 0.0 }
 0x24d   :  { %v474_v60 = vmin.f32 %v466_v56, 0.0  ;;  %v465_v61 = vadd.f32 %v456_v58, %v431_v57  ;;  %v475_v62 = vmul.f32 1.442695, %v471_v55  ;;  %866 = vpow2.f32 %v477_v59 }
 0x24e   :  { %vm470_vm5 = vcmp.gt.f32.partialorder %v466_v56, 0.0 }
 0x24f   :  { %v481_v63 = vmul.f32 1.442695, %v474_v60  ;;  %v473_v0 = vmin.f32 %v465_v61, 0.0  ;;  %vm469_vm6 = vcmp.gt.f32.partialorder %v465_v61, 0.0 }
 0x251   :  { %868 = vpow2.f32 %v481_v63  ;;  %v479_v1 = vmul.f32 1.442695, %v473_v0 }
 0x252   :  { %870 = vpow2.f32 %v475_v62 }
 0x253   :  { %872 = vpow2.f32 %v479_v1 }
 0x25a   :  { %v867_v2 = vpop.eup %866 }
 0x25b   :  { %v767_v9 = vadd.f32 -1.0, %v867_v2 }
 0x25d   :  { %v488_v12 = vsel %vm468_vm7, %v464_v46, %v767_v9 }
 0x25e   :  { %v869_v3 = vpop.eup %868 }
 0x25f   :  { %v871_v4 = vpop.eup %870  ;;  %v769_v5 = vadd.f32 -1.0, %v869_v3 }
 0x260   :  { %v873_v6 = vpop.eup %872  ;;  %v766_v11 = vadd.f32 -1.0, %v871_v4 }
 0x261   :  { %v490_v7 = vsel %vm470_vm5, %v466_v56, %v769_v5  ;;  %v768_v8 = vadd.f32 -1.0, %v873_v6 }
 0x262   :  { %828 = vmatprep.subr.mxu1 %v490_v7  ;;  %v487_v13 = vsel %vm467_vm8, %v463_v51, %v766_v11 }
 0x263   :  { %829 = vmatpush3.msra.mxu1 %v490_v7  ;;  %v489_v10 = vsel %vm469_vm6, %v465_v61, %v768_v8 }
 0x264   :  { %830 = vmatprep.subr.mxu1 %v489_v10 }
 0x265   :  { %831 = vmatpush3.msra.mxu1 %v489_v10 }
 0x266   :  { %832 = vmatprep.subr.mxu1 %v488_v12 }
 0x267   :  { %833 = vmatpush3.msra.mxu1 %v488_v12 }
 0x268   :  { %834 = vmatprep.subr.mxu1 %v487_v13 }
 0x269   :  { %835 = vmatpush3.msra.mxu1 %v487_v13 }
 0x26a   :  { %837 = vmatmul.mubr.msk.f32.vlgmr.msra.gmra.mxu1 %vm505_vm4, %v492_v17 }
 0x32a   :  { %v838_v22 = vpop.f32.mrf.mxu1 }
 0x32b   :  { %v584_v23 = vadd.f32 %v838_v22, %v503_v21 }
 0x32c   :  { %v578_v25 = vpop.f32.mrf.mxu1 }
 0x32d   :  { %v590_v26 = vmin.f32 %v584_v23, 0.0  ;;  %v579_v27 = vadd.f32 %v578_v25, %v498_v24  ;;  %vm588_vm10 = vcmp.gt.f32.partialorder %v584_v23, 0.0 }
 0x32f   :  { %v593_v15 = vmul.f32 1.442695, %v590_v26  ;;  %v589_v28 = vmin.f32 %v579_v27, 0.0  ;;  %vm587_vm11 = vcmp.gt.f32.partialorder %v579_v27, 0.0 }
 0x331   :  { %874 = vpow2.f32 %v593_v15  ;;  %v591_v29 = vmul.f32 1.442695, %v589_v28 }
 0x333   :  { %876 = vpow2.f32 %v591_v29 }
 0x33e   :  { %v875_v30 = vpop.eup %874 }
 0x33f   :  { %v773_v31 = vadd.f32 -1.0, %v875_v30 }
 0x340   :  { %v877_v32 = vpop.eup %876 }
 0x341   :  { %v598_v33 = vsel %vm588_vm10, %v584_v23, %v773_v31  ;;  %v772_v34 = vadd.f32 -1.0, %v877_v32 }
 0x342   :  { %v612_v35 = vmul.f32 %v609_v16, %v598_v33 }
 0x343   :  { %v597_v37 = vsel %vm587_vm11, %v579_v27, %v772_v34 }
 0x344   :  { %v611_v38 = vmul.f32 %v604_v36, %v597_v37  ;;  %v614_v39 = vsel %vm505_vm4, %v612_v35, 0.0 }
 0x346   :  { %v613_v40 = vsel %vm505_vm4, %v611_v38, 0.0 }
 0x347   :  { %v615_v41 = vadd.f32 %v614_v39, %v613_v40 }
 0x349   :  { %v616_v42 = vrot.slane %v615_v41, 4 }
 0x34b   :  { %v617_v43 = vadd.f32 %v616_v42, %v615_v41 }
 0x34d   :  { %v618_v44 = vrot.slane %v617_v43, 2 }
 0x34f   :  { %v619_v46 = vadd.f32 %v618_v44, %v617_v43 }
 0x351   :  { %v620_v48 = vrot.slane %v619_v46, 1 }
 0x353   :  { %v621_v50 = vadd.f32 %v620_v48, %v619_v46 }
 0x355   :  { %v632_v51 = vadd.f32 %v631_v49, %v621_v50 }
 0x357   :  { %v635_v52 = vmul.f32 1.442695, %v632_v51  ;;  %634 = vst.msk [vmem:[#allocation12] sm:$0x1] %vm633_vm12, %v632_v51 }
 0x359   :  { %878 = vpow2.f32 %v635_v52 }
 0x366   :  { %v879_v53 = vpop.eup %878 }
 0x367   :  { %844 = vmatmul.mubr.msk.f32.vlgmr.msra.gmra.mxu0 %vm505_vm4, %v879_v53 }
 0x368   :  { %991 = shalt.err (!%p988_p1)
}
 0x369   :  { %727 = dma.vmem_to_hbm [thread:$0]  %s725_s8, 16, %s1215_s10, [#allocation5]   ;;  %vm716_vm13 = vcmask 122880  }
 0x36a   :  { %s1045_s17 = smov [#allocation13]  }
 0x36b   :  { %s734_s18 = sshll.u32 %s1045_s17, 4  ;;  %s735_s18 = int_to_ptr.vmem [resolvable:$true] %s734_s18 }
 0x36c   :  { %s1000_s19 = scalar_lea.vmem %s735_s18, 16  ;;  %s1004_s5 = scalar_lea.vmem %s735_s18, 32 }
 0x36d   :  { %p1001_p2 = scmp.ne.s32.totalorder %s735_s18, %s1000_s19  ;;  %p1005_p3 = scmp.lt.s32.totalorder %s735_s18, %s735_s18 }
 0x36e   :  { %p1006_p4 = scmp.lt.s32.totalorder %s1004_s5, %s1000_s19 }
 0x370   :  { %p1007_p5 = por %p1006_p4, %p1005_p3 }
 0x372   :  { %p1008_p6 = pnand %p1007_p5, %p1001_p2 }
 0x427   :  { %v712_v14 = vpop.f32.mrf.mxu0 }
 0x428   :  { %717 = vst.msk [vmem:[#allocation13] sm:$0x1] %vm716_vm13, %v712_v14 }
 0x429   :  { %v845_v54 = vpop.f32.mrf.mxu0 }
 0x42a   :  { %1011 = shalt.err (!%p1008_p6)
}
 0x42b   :  { %737 = dma.vmem_to_hbm [thread:$0]  %s735_s18, 16, %s1216_s11, [#allocation14]  }
 0x42c   :  { %1026 = dma.done.wait [#allocation5], 16  }
 0x42d   :  { %1027 = vsyncadd [#allocation5], 4294967280 }
 0x42e   :  { %1028 = dma.done.wait [#allocation14], 16  }
 0x42f   :  { %1029 = vsyncadd [#allocation14], 4294967280 }
 0x430   :  { %744 = vsyncpa [#allocation4], 1 }
 0x431   :  { %745 = vsyncpa [#allocation7], 1 }
 0x432   :  { %746 = vsyncpa [#allocation10], 1 }
 0x433   :  { %747 = vsyncpa [#allocation5], 1 }
 0x434   :  { %748 = vsyncpa [#allocation14], 1 }

</bundles_post_ra>
